<compile_context>
chip_gen: v6e
topology: v6e:2x2x1
jax: 0.10.0
libtpu: 0.0.40
codegen_flags: <defaults>
</compile_context>

<pallas_src>
import jax
import jax.numpy as jnp
from jax.experimental import pallas as pl
from jax.experimental.pallas import tpu as pltpu


def _identity_copy_kernel(x_ref, o_ref):
    # One VMEM tile in, same tile out.  Pure vld/vst traffic; HBM-bound.
    o_ref[...] = x_ref[...]


def raw_sample_synth(x):
    """JAX/Pallas equivalent of RawSampleSynth.forward (identity)."""
    orig_shape = x.shape
    dtype = x.dtype

    flat = x.reshape(-1)
    n = flat.shape[0]

    itemsize = jnp.dtype(dtype).itemsize
    # Minimum sublane tile for this dtype: 8 (f32), 16 (bf16), 32 (int8/fp8).
    min_sub = max(8, 32 // max(itemsize, 1))

    # Lane-dense width (multiple of 128) so stores are unmasked full-width vst.
    W = 512
    rows = pl.cdiv(n, W)

    # Row-tile sized for ~2 MiB per block (double-buffered by the pipeline),
    # clamped to the actual row count and rounded to the sublane minimum.
    # Safe under v5e's 16 MiB scoped-VMEM default; large enough to amortize
    # the ~0.35 us/step grid overhead on v6e/v7x.
    tm_target = max(min_sub, (2 << 20) // (W * itemsize))
    tm = min(tm_target, max(rows, 1))
    tm = max(min_sub, (tm // min_sub) * min_sub)

    rows_pad = pl.cdiv(rows, tm) * tm
    total_pad = rows_pad * W

    # Pad the flattened vector so the (tm, W) blocks tile the array exactly
    # (ragged tails handled in the wrapper, not with masked stores).
    padded = jnp.zeros((total_pad,), dtype=dtype).at[:n].set(flat)
    padded2d = padded.reshape(rows_pad, W)

    out2d = pl.pallas_call(
        _identity_copy_kernel,
        out_shape=jax.ShapeDtypeStruct((rows_pad, W), dtype),
        grid=(rows_pad // tm,),
        in_specs=[pl.BlockSpec((tm, W), lambda i: (i, 0))],
        out_specs=pl.BlockSpec((tm, W), lambda i: (i, 0)),
        compiler_params=pltpu.CompilerParams(
            dimension_semantics=("parallel",),  # lets v7x shard across 2 TCs
        ),
    )(padded2d)

    return out2d.reshape(-1)[:n].reshape(orig_shape)


if __name__ == "__main__":
    key = jax.random.PRNGKey(0)
    # Small NCHW-like input; forward is shape-agnostic (identity).
    x = jax.random.normal(key, (2, 4, 16, 16), dtype=jnp.float32)

    out = raw_sample_synth(x)
    jax.block_until_ready(out)

    assert out.shape == x.shape
    assert out.dtype == x.dtype
    assert jnp.array_equal(out, x), "identity kernel must return the input unchanged"

    print("KERNEL_OK")
</pallas_src>

<mosaic_0001>
module attributes {stable_mosaic.version = 11 : i64} {
  func.func @_identity_copy_kernel(%arg0: i32, %arg1: memref<8x512xf32, #tpu.memory_space<vmem>>, %arg2: memref<8x512xf32, #tpu.memory_space<vmem>>) attributes {dimension_semantics = [#tpu.dimension_semantics<parallel>], iteration_bounds = array<i64: 1>, scalar_prefetch = 0 : i64, scratch_operands = 0 : i64, tpu.core_type = #tpu.core_type<tc>, window_params = [{transform_indices = @transform_0, window_bounds = array<i64: 8, 512>}, {transform_indices = @transform_1, window_bounds = array<i64: 8, 512>}]} {
    %c0 = arith.constant 0 : index
    %c0_0 = arith.constant 0 : index
    %0 = vector.load %arg1[%c0, %c0_0] : memref<8x512xf32, #tpu.memory_space<vmem>>, vector<8x512xf32>
    %c0_1 = arith.constant 0 : index
    %c0_2 = arith.constant 0 : index
    %1 = vector.load %arg2[%c0_1, %c0_2] : memref<8x512xf32, #tpu.memory_space<vmem>>, vector<8x512xf32>
    tpu.vector_store %arg2[%c0_1, %c0_2], %0 {strides = array<i32>} : memref<8x512xf32, #tpu.memory_space<vmem>>, vector<8x512xf32>,
    return
  }
  func.func @transform_0(%arg0: i32) -> (i32, i32) {
    %c0_i32 = arith.constant 0 : i32
    %c0_i32_0 = arith.constant 0 : i32
    return %arg0, %c0_i32 : i32, i32
  }
  func.func @transform_1(%arg0: i32) -> (i32, i32) {
    %c0_i32 = arith.constant 0 : i32
    %c0_i32_0 = arith.constant 0 : i32
    return %arg0, %c0_i32 : i32, i32
  }
}

</mosaic_0001>

<bundles_post_ra>
// kernel: tpu_custom_call.1
= control target key start
LH: loop header
LB: loop body
LE: loop exit
PB: predicated region body
PF: predicated region fallthrough
CT: control target
= control target key end

     0   :  { %6 = vsyncpa [#allocation3], 0  ;;  %s108_s0 = inlined_call_operand.hbm [shape: f32[8,512], index: 0, kind: input, shape index: {}]   ;;  %s109_s1 = inlined_call_operand.hbm [shape: f32[8,512], index: 1, kind: output, shape index: {}]  }
   0x1   :  { %7 = vsyncpa [#allocation4], 0  ;;  %s90_s6 = smov [#allocation2]  }
   0x2   :  { %s14_s7 = sshll.u32 %s90_s6, 4  ;;  %s15_s7 = int_to_ptr.vmem [resolvable:$true] %s14_s7 }
   0x3   :  { %s54_s8 = scalar_lea.vmem %s15_s7, 512  ;;  %p59_p1 = scmp.lt.s32.totalorder %s15_s7, %s15_s7 }
   0x4   :  { %p55_p0 = scmp.ne.s32.totalorder %s15_s7, %s54_s8  ;;  %p60_p2 = scmp.lt.s32.totalorder %s54_s8, %s54_s8 }
   0x6   :  { %p61_p3 = por %p60_p2, %p59_p1 }
   0x8   :  { %p62_p4 = pnand %p61_p3, %p55_p0 }
   0xa   :  { %65 = shalt.err (!%p62_p4)
}
   0xb   :  { %17 = dma.hbm_to_vmem [thread:$0]  %s108_s0, 512, %s15_s7, [#allocation3]  }
   0xc   :  { %86 = dma.done.wait [#allocation3], 512  }
   0xd   :  { %87 = vsyncadd [#allocation3], 4294966784  ;;  %s91_s11 = smov [#allocation5]   ;;  %v21_v0 = vld [vmem:[#allocation2] sm:$0xff]  ;;  %v22_v1 = vld [vmem:[#allocation2 + $0x8] sm:$0xff] }
   0xe   :  { %s35_s12 = sshll.u32 %s91_s11, 4  ;;  %v23_v2 = vld [vmem:[#allocation2 + $0x10] sm:$0xff]  ;;  %25 = vst [vmem:[#allocation5] sm:$0xff] %v21_v0  ;;  %26 = vst [vmem:[#allocation5 + $0x8] sm:$0xff] %v22_v1  ;;  %v24_v3 = vld [vmem:[#allocation2 + $0x18] sm:$0xff]  ;;  %s36_s12 = int_to_ptr.vmem [resolvable:$true] %s35_s12 }
   0xf   :  { %27 = vst [vmem:[#allocation5 + $0x10] sm:$0xff] %v23_v2  ;;  %28 = vst [vmem:[#allocation5 + $0x18] sm:$0xff] %v24_v3  ;;  %s66_s13 = scalar_lea.vmem %s36_s12, 512  ;;  %p71_p6 = scmp.lt.s32.totalorder %s36_s12, %s36_s12 }
  0x10   :  { %p67_p5 = scmp.ne.s32.totalorder %s36_s12, %s66_s13  ;;  %p72_p7 = scmp.lt.s32.totalorder %s66_s13, %s66_s13 }
  0x12   :  { %p73_p8 = por %p72_p7, %p71_p6 }
  0x14   :  { %p74_p9 = pnand %p73_p8, %p67_p5 }
  0x16   :  { %77 = shalt.err (!%p74_p9)
}
  0x17   :  { %38 = dma.vmem_to_hbm [thread:$0]  %s36_s12, 512, %s109_s1, [#allocation4]  }
  0x18   :  { %88 = dma.done.wait [#allocation4], 512  }
  0x19   :  { %89 = vsyncadd [#allocation4], 4294966784 }
  0x1a   :  { %42 = vsyncpa [#allocation3], 1 }
  0x1b   :  { %43 = vsyncpa [#allocation4], 1 }

</bundles_post_ra>
